<compile_context>
chip_gen: v5e
topology: v5e:2x2
jax: 0.10.0
libtpu: 0.0.40
codegen_flags: <defaults>
</compile_context>

<pallas_src>
import functools

import jax
import jax.numpy as jnp
from jax.experimental import pallas as pl
from jax.experimental.pallas import tpu as pltpu


def _round_up(x, m):
    return ((x + m - 1) // m) * m


def _reward_net_kernel(s_ref, a_ref, sp_ref,
                       w1_ref, b1_ref,
                       w2_ref, b2_ref,
                       w3_ref, b3_ref,
                       out_ref):
    # Layer 1: normalization pre-folded into (W1, b1). Concat the three
    # lane-narrow tiles in VMEM so layer 1 is a single K=32 matmul instead of
    # three K<=12 matmuls (MXU pushes scale with num_matmuls, not tiny K).
    x = jnp.concatenate([s_ref[...], a_ref[...], sp_ref[...]], axis=-1)
    h = jnp.dot(x.astype(jnp.bfloat16), w1_ref[...],
                preferred_element_type=jnp.float32)
    h = jnp.maximum(h + b1_ref[...], 0.0)

    # Layer 2 + ReLU (bf16 MXU operands, f32 accumulate, bias/ReLU in f32).
    h = jnp.dot(h.astype(jnp.bfloat16), w2_ref[...],
                preferred_element_type=jnp.float32) + b2_ref[...]
    h = jnp.maximum(h, 0.0)

    # Layer 3 (hidden -> 1): VPU multiply + lane reduction instead of an
    # N=1 MXU matmul. Output scale/shift already folded into w3/b3.
    out_ref[...] = jnp.sum(h * w3_ref[...], axis=-1, keepdims=True) + b3_ref[...]
    # TODO(synk): the (tb, 1) output stays lane-sparse (masked stores); a
    # lane-dense layout needs feature-major (transposed) inputs the caller
    # does not provide, and the output is ~1/32 of the input HBM traffic.


@functools.partial(jax.jit, static_argnames=("block_rows",))
def reward_net_forward(s, a, sp, params, *, block_rows=4096):
    """Pallas TPU implementation of RewardNet.forward."""
    s = jnp.asarray(s, jnp.float32)
    a = jnp.asarray(a, jnp.float32)
    sp = jnp.asarray(sp, jnp.float32)
    B, sd = s.shape
    ad = a.shape[1]

    w1 = jnp.asarray(params["w1"], jnp.float32)   # [D_in, H1]
    b1 = jnp.asarray(params["b1"], jnp.float32)   # [1, H1]
    w2 = jnp.asarray(params["w2"], jnp.float32)   # [H1, H2]
    b2 = jnp.asarray(params["b2"], jnp.float32)   # [1, H2]
    w3 = jnp.asarray(params["w3"], jnp.float32)   # [H2, 1]
    b3 = jnp.asarray(params["b3"], jnp.float32)   # [1, 1]
    H1, H2 = w1.shape[1], w2.shape[1]
    d_in = sd + ad + sd

    # --- fold input normalization into layer 1 (wrapper-side, O(D_in*H1)) ---
    shift = jnp.concatenate(
        [params["s_shift"], params["a_shift"], params["s_shift"]]).astype(jnp.float32)
    scale = jnp.concatenate(
        [params["s_scale"], params["a_scale"], params["s_scale"]]).astype(jnp.float32)
    inv = 1.0 / (scale + 1e-8)
    w1_eff = (w1 * inv[:, None]).astype(jnp.bfloat16)     # bf16 MXU operand
    b1_eff = b1 - (shift * inv)[None, :] @ w1             # f32 bias
    w2_bf = w2.astype(jnp.bfloat16)

    # --- fold output de-normalization into layer 3 (no host float() sync) ---
    out_scale = jnp.asarray(params["out_scale"], jnp.float32) + 1e-8
    out_shift = jnp.asarray(params["out_shift"], jnp.float32)
    w3_row = (w3 * out_scale).reshape(1, H2)               # [1, H2] f32 row
    b3_eff = (b3 * out_scale + out_shift).reshape(1, 1)

    # --- batch tiling: no full-array pad. grid = cdiv(B, tb); the partial
    # last block is read-padded / write-masked by Pallas. Tile sized so the
    # grid has ~8 steps when B is large (pipelining + v7x 2-TC split). ---
    if B <= 8:
        tb = B                                            # full-extent block
    else:
        tb = _round_up(min(block_rows, pl.cdiv(B, 8)), 8)
    grid = (pl.cdiv(B, tb),)

    def row_spec(d):
        return pl.BlockSpec((tb, d), lambda i: (i, 0))

    def const_spec(shp):
        # Full-array block with a constant index_map -> DMA'd once, stays
        # VMEM-resident across all grid steps.
        return pl.BlockSpec(shp, lambda i: (0, 0))

    out = pl.pallas_call(
        _reward_net_kernel,
        out_shape=jax.ShapeDtypeStruct((B, 1), jnp.float32),
        grid=grid,
        in_specs=[
            row_spec(sd), row_spec(ad), row_spec(sd),
            const_spec((d_in, H1)), const_spec((1, H1)),
            const_spec((H1, H2)), const_spec((1, H2)),
            const_spec((1, H2)), const_spec((1, 1)),
        ],
        out_specs=pl.BlockSpec((tb, 1), lambda i: (i, 0)),
        compiler_params=pltpu.CompilerParams(
            dimension_semantics=("parallel",),
            vmem_limit_bytes=64 << 20),
    )(s, a, sp, w1_eff, b1_eff, w2_bf, b2, w3_row, b3_eff)

    return out


def init_reward_net_params(key, state_dim, act_dim, hidden_size=(64, 64)):
    """Init mirroring nn.Linear default (uniform +-1/sqrt(fan_in)); W stored [in, out]."""
    layer_sizes = (state_dim + act_dim + state_dim,) + tuple(hidden_size) + (1,)
    params = {}
    for i in range(len(layer_sizes) - 1):
        fan_in, fan_out = layer_sizes[i], layer_sizes[i + 1]
        key, kw, kb = jax.random.split(key, 3)
        bound = 1.0 / jnp.sqrt(jnp.asarray(fan_in, jnp.float32))
        params[f"w{i+1}"] = jax.random.uniform(
            kw, (fan_in, fan_out), jnp.float32, -bound, bound)
        params[f"b{i+1}"] = jax.random.uniform(
            kb, (1, fan_out), jnp.float32, -bound, bound)
    # default transformations (set_transformations with all None)
    params["s_shift"] = jnp.zeros((state_dim,), jnp.float32)
    params["s_scale"] = jnp.ones((state_dim,), jnp.float32)
    params["a_shift"] = jnp.zeros((act_dim,), jnp.float32)
    params["a_scale"] = jnp.ones((act_dim,), jnp.float32)
    params["out_shift"] = 0.0
    params["out_scale"] = 1.0
    return params


def reward_net_reference(s, a, sp, params):
    """Pure-JAX (f32) mirror of RewardNet.forward (PyTorch semantics)."""
    s_n = (s - params["s_shift"]) / (params["s_scale"] + 1e-8)
    a_n = (a - params["a_shift"]) / (params["a_scale"] + 1e-8)
    sp_n = (sp - params["s_shift"]) / (params["s_scale"] + 1e-8)
    out = jnp.concatenate([s_n, a_n, sp_n], axis=-1)
    out = jnp.maximum(out @ params["w1"] + params["b1"], 0.0)
    out = jnp.maximum(out @ params["w2"] + params["b2"], 0.0)
    out = out @ params["w3"] + params["b3"]
    return out * (params["out_scale"] + 1e-8) + params["out_shift"]


if __name__ == "__main__":
    state_dim, act_dim, hidden = 12, 8, (64, 64)

    key = jax.random.PRNGKey(0)
    kp, ks, ka, ksp, ksh, ksc, kah, kac = jax.random.split(key, 8)

    params = init_reward_net_params(kp, state_dim, act_dim, hidden)
    # Non-trivial transformations to exercise the weight folding.
    params["s_shift"] = 0.2 * jax.random.normal(ksh, (state_dim,), jnp.float32)
    params["s_scale"] = 0.5 + jnp.abs(jax.random.normal(ksc, (state_dim,), jnp.float32))
    params["a_shift"] = 0.2 * jax.random.normal(kah, (act_dim,), jnp.float32)
    params["a_scale"] = 0.5 + jnp.abs(jax.random.normal(kac, (act_dim,), jnp.float32))
    params["out_shift"] = 0.3
    params["out_scale"] = 2.0

    # Kernel uses bf16 MXU operands (f32 accumulation); compare against the
    # pure-f32 reference with a correspondingly loose tolerance.
    TOL = dict(atol=5e-2, rtol=5e-2)

    # Case 1: small batch, single tile.
    batch = 8
    s = jax.random.normal(ks, (batch, state_dim), jnp.float32)
    a = jax.random.normal(ka, (batch, act_dim), jnp.float32)
    sp = jax.random.normal(ksp, (batch, state_dim), jnp.float32)

    out = reward_net_forward(s, a, sp, params)
    jax.block_until_ready(out)
    ref = reward_net_reference(s, a, sp, params)
    assert out.shape == (batch, 1)
    assert jnp.allclose(out, ref, **TOL)

    # Case 2: ragged batch, multi-tile grid with a partial last block
    # (exercises cdiv grid + read-padding / masked output writes).
    batch2 = 37
    k1, k2, k3 = jax.random.split(jax.random.PRNGKey(1), 3)
    s2 = jax.random.normal(k1, (batch2, state_dim), jnp.float32)
    a2 = jax.random.normal(k2, (batch2, act_dim), jnp.float32)
    sp2 = jax.random.normal(k3, (batch2, state_dim), jnp.float32)

    out2 = reward_net_forward(s2, a2, sp2, params, block_rows=16)
    jax.block_until_ready(out2)
    ref2 = reward_net_reference(s2, a2, sp2, params)
    assert out2.shape == (batch2, 1)
    assert jnp.allclose(out2, ref2, **TOL)

    # Case 3: tiny batch (< 8) -> single full-extent block, no padding.
    batch3 = 5
    k4, k5, k6 = jax.random.split(jax.random.PRNGKey(2), 3)
    s3 = jax.random.normal(k4, (batch3, state_dim), jnp.float32)
    a3 = jax.random.normal(k5, (batch3, act_dim), jnp.float32)
    sp3 = jax.random.normal(k6, (batch3, state_dim), jnp.float32)

    out3 = reward_net_forward(s3, a3, sp3, params)
    jax.block_until_ready(out3)
    ref3 = reward_net_reference(s3, a3, sp3, params)
    assert out3.shape == (batch3, 1)
    assert jnp.allclose(out3, ref3, **TOL)

    print("KERNEL_OK")
</pallas_src>

<mosaic_0001>
module attributes {stable_mosaic.version = 11 : i64} {
  func.func @_reward_net_kernel(%arg0: i32, %arg1: memref<8x12xf32, #tpu.memory_space<vmem>>, %arg2: memref<8x8xf32, #tpu.memory_space<vmem>>, %arg3: memref<8x12xf32, #tpu.memory_space<vmem>>, %arg4: memref<32x64xbf16, #tpu.memory_space<vmem>>, %arg5: memref<1x64xf32, #tpu.memory_space<vmem>>, %arg6: memref<64x64xbf16, #tpu.memory_space<vmem>>, %arg7: memref<1x64xf32, #tpu.memory_space<vmem>>, %arg8: memref<1x64xf32, #tpu.memory_space<vmem>>, %arg9: memref<1x1xf32, #tpu.memory_space<vmem>>, %arg10: memref<8x1xf32, #tpu.memory_space<vmem>>) attributes {dimension_semantics = [#tpu.dimension_semantics<parallel>], iteration_bounds = array<i64: 1>, scalar_prefetch = 0 : i64, scratch_operands = 0 : i64, tpu.core_type = #tpu.core_type<tc>, window_params = [{transform_indices = @transform_0, window_bounds = array<i64: 8, 12>}, {transform_indices = @transform_1, window_bounds = array<i64: 8, 8>}, {transform_indices = @transform_2, window_bounds = array<i64: 8, 12>}, {pipeline_mode = #tpu.pipeline_mode<synchronous>, transform_indices = @transform_3, window_bounds = array<i64: 32, 64>}, {pipeline_mode = #tpu.pipeline_mode<synchronous>, transform_indices = @transform_4, window_bounds = array<i64: 1, 64>}, {pipeline_mode = #tpu.pipeline_mode<synchronous>, transform_indices = @transform_5, window_bounds = array<i64: 64, 64>}, {pipeline_mode = #tpu.pipeline_mode<synchronous>, transform_indices = @transform_6, window_bounds = array<i64: 1, 64>}, {pipeline_mode = #tpu.pipeline_mode<synchronous>, transform_indices = @transform_7, window_bounds = array<i64: 1, 64>}, {pipeline_mode = #tpu.pipeline_mode<synchronous>, transform_indices = @transform_8, window_bounds = array<i64: 1, 1>}, {transform_indices = @transform_9, window_bounds = array<i64: 8, 1>}]} {
    %c0 = arith.constant 0 : index
    %c0_0 = arith.constant 0 : index
    %0 = vector.load %arg1[%c0, %c0_0] : memref<8x12xf32, #tpu.memory_space<vmem>>, vector<8x12xf32>
    %c0_1 = arith.constant 0 : index
    %c0_2 = arith.constant 0 : index
    %1 = vector.load %arg2[%c0_1, %c0_2] : memref<8x8xf32, #tpu.memory_space<vmem>>, vector<8x8xf32>
    %c0_3 = arith.constant 0 : index
    %c0_4 = arith.constant 0 : index
    %2 = vector.load %arg3[%c0_3, %c0_4] : memref<8x12xf32, #tpu.memory_space<vmem>>, vector<8x12xf32>
    %3 = tpu.concatenate %0, %1, %2 in 1 : vector<8x12xf32>, vector<8x8xf32>, vector<8x12xf32> -> vector<8x32xf32>
    %4 = arith.truncf %3 : vector<8x32xf32> to vector<8x32xbf16>
    %c0_5 = arith.constant 0 : index
    %c0_6 = arith.constant 0 : index
    %5 = vector.load %arg4[%c0_5, %c0_6] : memref<32x64xbf16, #tpu.memory_space<vmem>>, vector<32x64xbf16>
    %cst = arith.constant dense<0.000000e+00> : vector<8x64xf32>
    %6 = tpu.matmul %4, %5, %cst {dimension_numbers = #tpu.dot_dimension_numbers<[1], [0], [0], [1], [0, 0, 1, 1], [], []>} : vector<8x32xbf16>, vector<32x64xbf16>, vector<8x64xf32> -> vector<8x64xf32>
    %c0_7 = arith.constant 0 : index
    %c0_8 = arith.constant 0 : index
    %7 = vector.load %arg5[%c0_7, %c0_8] : memref<1x64xf32, #tpu.memory_space<vmem>>, vector<1x64xf32>
    %8 = vector.broadcast %7 : vector<1x64xf32> to vector<8x64xf32>
    %9 = arith.addf %6, %8 : vector<8x64xf32>
    %cst_9 = arith.constant 0.000000e+00 : f32
    %10 = vector.broadcast %cst_9 : f32 to vector<8x64xf32>
    %11 = arith.maximumf %9, %10 : vector<8x64xf32>
    %12 = arith.truncf %11 : vector<8x64xf32> to vector<8x64xbf16>
    %c0_10 = arith.constant 0 : index
    %c0_11 = arith.constant 0 : index
    %13 = vector.load %arg6[%c0_10, %c0_11] : memref<64x64xbf16, #tpu.memory_space<vmem>>, vector<64x64xbf16>
    %cst_12 = arith.constant dense<0.000000e+00> : vector<8x64xf32>
    %14 = tpu.matmul %12, %13, %cst_12 {dimension_numbers = #tpu.dot_dimension_numbers<[1], [0], [0], [1], [0, 0, 1, 1], [], []>} : vector<8x64xbf16>, vector<64x64xbf16>, vector<8x64xf32> -> vector<8x64xf32>
    %c0_13 = arith.constant 0 : index
    %c0_14 = arith.constant 0 : index
    %15 = vector.load %arg7[%c0_13, %c0_14] : memref<1x64xf32, #tpu.memory_space<vmem>>, vector<1x64xf32>
    %16 = vector.broadcast %15 : vector<1x64xf32> to vector<8x64xf32>
    %17 = arith.addf %14, %16 : vector<8x64xf32>
    %cst_15 = arith.constant 0.000000e+00 : f32
    %18 = vector.broadcast %cst_15 : f32 to vector<8x64xf32>
    %19 = arith.maximumf %17, %18 : vector<8x64xf32>
    %c0_16 = arith.constant 0 : index
    %c0_17 = arith.constant 0 : index
    %20 = vector.load %arg8[%c0_16, %c0_17] : memref<1x64xf32, #tpu.memory_space<vmem>>, vector<1x64xf32>
    %21 = vector.broadcast %20 : vector<1x64xf32> to vector<8x64xf32>
    %22 = arith.mulf %19, %21 : vector<8x64xf32>
    %cst_18 = arith.constant dense<0.000000e+00> : vector<8xf32>
    %23 = vector.multi_reduction <add>, %22, %cst_18 [1] : vector<8x64xf32> to vector<8xf32>
    %24 = vector.shape_cast %23 : vector<8xf32> to vector<8x1xf32>
    %c0_19 = arith.constant 0 : index
    %c0_20 = arith.constant 0 : index
    %25 = vector.load %arg9[%c0_19, %c0_20] : memref<1x1xf32, #tpu.memory_space<vmem>>, vector<1x1xf32>
    %26 = vector.broadcast %25 : vector<1x1xf32> to vector<8x1xf32>
    %27 = arith.addf %24, %26 : vector<8x1xf32>
    %c0_21 = arith.constant 0 : index
    %c0_22 = arith.constant 0 : index
    %28 = vector.load %arg10[%c0_21, %c0_22] : memref<8x1xf32, #tpu.memory_space<vmem>>, vector<8x1xf32>
    tpu.vector_store %arg10[%c0_21, %c0_22], %27 {strides = array<i32>} : memref<8x1xf32, #tpu.memory_space<vmem>>, vector<8x1xf32>,
    return
  }
  func.func @transform_0(%arg0: i32) -> (i32, i32) {
    %c0_i32 = arith.constant 0 : i32
    %c0_i32_0 = arith.constant 0 : i32
    return %arg0, %c0_i32 : i32, i32
  }
  func.func @transform_1(%arg0: i32) -> (i32, i32) {
    %c0_i32 = arith.constant 0 : i32
    %c0_i32_0 = arith.constant 0 : i32
    return %arg0, %c0_i32 : i32, i32
  }
  func.func @transform_2(%arg0: i32) -> (i32, i32) {
    %c0_i32 = arith.constant 0 : i32
    %c0_i32_0 = arith.constant 0 : i32
    return %arg0, %c0_i32 : i32, i32
  }
  func.func @transform_3(%arg0: i32) -> (i32, i32) {
    %c0_i32 = arith.constant 0 : i32
    %c0_i32_0 = arith.constant 0 : i32
    %c0_i32_1 = arith.constant 0 : i32
    return %c0_i32, %c0_i32_0 : i32, i32
  }
  func.func @transform_4(%arg0: i32) -> (i32, i32) {
    %c0_i32 = arith.constant 0 : i32
    %c0_i32_0 = arith.constant 0 : i32
    %c0_i32_1 = arith.constant 0 : i32
    return %c0_i32, %c0_i32_0 : i32, i32
  }
  func.func @transform_5(%arg0: i32) -> (i32, i32) {
    %c0_i32 = arith.constant 0 : i32
    %c0_i32_0 = arith.constant 0 : i32
    %c0_i32_1 = arith.constant 0 : i32
    return %c0_i32, %c0_i32_0 : i32, i32
  }
  func.func @transform_6(%arg0: i32) -> (i32, i32) {
    %c0_i32 = arith.constant 0 : i32
    %c0_i32_0 = arith.constant 0 : i32
    %c0_i32_1 = arith.constant 0 : i32
    return %c0_i32, %c0_i32_0 : i32, i32
  }
  func.func @transform_7(%arg0: i32) -> (i32, i32) {
    %c0_i32 = arith.constant 0 : i32
    %c0_i32_0 = arith.constant 0 : i32
    %c0_i32_1 = arith.constant 0 : i32
    return %c0_i32, %c0_i32_0 : i32, i32
  }
  func.func @transform_8(%arg0: i32) -> (i32, i32) {
    %c0_i32 = arith.constant 0 : i32
    %c0_i32_0 = arith.constant 0 : i32
    %c0_i32_1 = arith.constant 0 : i32
    return %c0_i32, %c0_i32_0 : i32, i32
  }
  func.func @transform_9(%arg0: i32) -> (i32, i32) {
    %c0_i32 = arith.constant 0 : i32
    %c0_i32_0 = arith.constant 0 : i32
    return %arg0, %c0_i32 : i32, i32
  }
}

</mosaic_0001>

<bundles_post_ra>
// kernel: reward_net_forward.1
= control target key start
LH: loop header
LB: loop body
LE: loop exit
PB: predicated region body
PF: predicated region fallthrough
CT: control target
= control target key end

     0   :  { %s201_s11 = smov 12   ;;  %s202_s14 = smov 20   ;;  %vm46_vm0 = vcmask 97280   ;;  %vm48_vm1 = vcmask 162816   ;;  %vm71_vm2 = vcmask 261120   ;;  %vm126_vm3 = vcmask 523264   ;;  %s295_s1 = inlined_call_operand.vmem [shape: f32[8,8], index: 1, kind: input, shape index: {}]   ;;  %s296_s4 = inlined_call_operand.vmem [shape: f32[1,64], index: 4, kind: input, shape index: {}]   ;;  %s297_s2 = inlined_call_operand.vmem [shape: f32[8,12], index: 2, kind: input, shape index: {}]   ;;  %s298_s3 = inlined_call_operand.vmem [shape: bf16[32,64], index: 3, kind: input, shape index: {}]   ;;  %s299_s5 = inlined_call_operand.vmem [shape: bf16[64,64], index: 5, kind: input, shape index: {}]   ;;  %s300_s0 = inlined_call_operand.vmem [shape: f32[8,12], index: 0, kind: input, shape index: {}]   ;;  %s301_s6 = inlined_call_operand.vmem [shape: f32[1,64], index: 6, kind: input, shape index: {}]   ;;  %s302_s7 = inlined_call_operand.vmem [shape: f32[1,64], index: 7, kind: input, shape index: {}]   ;;  %s303_s8 = inlined_call_operand.<no memory space> [shape: f32[1,1], index: 8, kind: input, shape index: {}]   ;;  %s304_s9 = inlined_call_operand.vmem [shape: f32[8,1], index: 9, kind: output, shape index: {}]  }
   0x1   :  { %v36_v0 = vld [vmem:[%s295_s1] sm:$0xff]  ;;  %v190_v2 = vld [vmem:[%s298_s3 + $0x8] sm:$0xff]  ;;  %v194_v4 = vld [vmem:[%s299_s5 + $0x18] sm:$0xff]  ;;  %v14_v20 = vstv %s303_s8  ;;  %vm157_vm4 = vcmask 7168  }
   0x2   :  { %39 = vrot.lane.b32.xlu0 %v36_v0, %s201_s11  ;;  %v37_v1 = vld [vmem:[%s297_s2] sm:$0xff]  ;;  %81 = vmatpush.bf16.msra.mxu0 %v190_v2  ;;  %v193_v5 = vld [vmem:[%s299_s5 + $0x10] sm:$0xff]  ;;  %v192_v12 = vld [vmem:[%s299_s5 + $0x8] sm:$0xff]  ;;  %15 = vst [vmem:[#allocation2] sm:$0x1] %v14_v20 }
   0x3   :  { %v189_v3 = vld [vmem:[%s298_s3] sm:$0xff]  ;;  %134 = vmatpush.bf16.msra.mxu1 %v194_v4 }
   0x4   :  { %v35_v7 = vld [vmem:[%s300_s0] sm:$0xff] }
   0x5   :  { %v191_v13 = vld [vmem:[%s299_s5] sm:$0xff] }
   0x6   :  { %82 = vmatpush.bf16.msra.mxu0 %v189_v3  ;;  %v197_v14 = vld [vmem:[%s296_s4] ss:$0 sm:$0xff] }
   0x7   :  { %135 = vmatpush.bf16.msra.mxu1 %v193_v5  ;;  %v198_v21 = vld [vmem:[%s301_s6] ss:$0 sm:$0xff] }
   0x8   :  { %v199_v24 = vld [vmem:[%s302_s7] ss:$0 sm:$0xff] }
   0x9   :  { %v200_v29 = vld [vmem:[#allocation2] ss:$0 sm:$0xff] }
   0xa   :  { %43 = vrot.lane.b32.xlu0 %v37_v1, %s202_s14 }
   0xb   :  { %136 = vmatpush.bf16.msra.mxu1 %v192_v12 }
   0xf   :  { %137 = vmatpush.bf16.msra.mxu1 %v191_v13 }
  0x74   :  { %v40_v6 = vpop.permute.xlu0 %39 }
  0x75   :  { %v47_v8 = vsel %vm46_vm0, %v35_v7, %v40_v6 }
  0x7c   :  { %v44_v9 = vpop.permute.xlu0 %43 }
  0x7d   :  { %v49_v10 = vsel %vm48_vm1, %v47_v8, %v44_v9 }
  0x7e   :  { %v50_v11 = vpack.c.bf16 %v49_v10, %v49_v10 }
  0x80   :  { %171 = vmatmul.msk.bf16.vlgmr.msra.gmra.mxu0 %vm71_vm2, %v50_v11 }
  0xfd   :  { %v84_v15 = vpop.f32.mrf.mxu0 }
  0xfe   :  { %v85_v16 = vadd.f32 %v197_v14, %v84_v15 }
 0x100   :  { %v88_v17 = vmax.f32 %v85_v16, 0.0 }
 0x102   :  { %v89_v18 = vpack.c.bf16 %v88_v17, %v88_v17 }
 0x104   :  { %188 = vmatmul.msk.bf16.vlgmr.msra.gmra.mxu1 %vm126_vm3, %v89_v18 }
 0x105   :  { %v86_v19 = vpop.f32.mrf.mxu0 }
 0x181   :  { %v139_v22 = vpop.f32.mrf.mxu1 }
 0x182   :  { %v140_v23 = vadd.f32 %v198_v21, %v139_v22 }
 0x184   :  { %v143_v25 = vmax.f32 %v140_v23, 0.0 }
 0x186   :  { %v148_v26 = vmul.f32 %v199_v24, %v143_v25 }
 0x188   :  { %v149_v27 = vsel %vm126_vm3, %v148_v26, 0.0 }
 0x189   :  { %v141_v28 = vpop.f32.mrf.mxu1  ;;  %150 = vadd.xlane.f32.xlu1 %v149_v27 }
 0x1fc   :  { %v151_v30 = vpop.xlane.xlu1 %150 }
 0x1fd   :  { %v156_v31 = vadd.f32 %v200_v29, %v151_v30 }
 0x1ff   :  { %158 = vst.msk [vmem:[%s304_s9] sm:$0xff] %vm157_vm4, %v156_v31 }

</bundles_post_ra>
